<compile_context>
chip_gen: v5e
topology: v5e:2x2
jax: 0.10.0
libtpu: 0.0.40
codegen_flags: <defaults>
</compile_context>

<pallas_src>
import jax
import jax.numpy as jnp
from jax.experimental import pallas as pl
from jax.experimental.pallas import tpu as pltpu


def _round_up(x, m):
    return ((x + m - 1) // m) * m


def cascade_kernel(x_ref, w1_ref, b1_ref, w2_ref, b2_ref, o_ref):
    # model_1: Linear + ReLU (bf16 operands, f32 accumulation)
    h = jnp.dot(x_ref[...], w1_ref[...], preferred_element_type=jnp.float32)
    h = jnp.maximum(h + b1_ref[...], 0.0)
    # model_2: Linear (1/gain already folded into w2 by the wrapper)
    y = jnp.dot(h.astype(w2_ref.dtype), w2_ref[...],
                preferred_element_type=jnp.float32)
    o_ref[...] = (y + b2_ref[...]).astype(o_ref.dtype)


def cascade_forward(x, w1, b1, w2, b2, gain=None, cascade_type=None,
                    block_b=512):
    """Fused CascadeModel forward.

    x : (B, D_in) f32
    w1: (D_in, D_hid), b1: (D_hid,) or (1, D_hid)
    w2: (D_hid, D_out), b2: (D_out,) or (1, D_out)
    """
    B, D_in = x.shape
    D_hid = w1.shape[1]
    D_out = w2.shape[1]

    b1 = jnp.reshape(b1, (1, D_hid)).astype(jnp.float32)
    b2 = jnp.reshape(b2, (1, D_out)).astype(jnp.float32)

    # Fold the cascade gain into the second weight matrix (exact, done once).
    if cascade_type == 'ila' and gain:
        w2 = w2 * (1.0 / float(gain))

    # Lane-dense padding: feature dims up to multiples of 128, batch to the tile.
    D_in_p = _round_up(D_in, 128)
    D_hid_p = _round_up(D_hid, 128)
    D_out_p = _round_up(D_out, 128)
    TB = min(block_b, _round_up(B, 8))
    B_p = _round_up(B, TB)

    x_p = jnp.zeros((B_p, D_in_p), jnp.float32).at[:B, :D_in].set(x)
    w1_p = jnp.zeros((D_in_p, D_hid_p), jnp.float32).at[:D_in, :D_hid].set(w1)
    b1_p = jnp.zeros((1, D_hid_p), jnp.float32).at[:, :D_hid].set(b1)
    w2_p = jnp.zeros((D_hid_p, D_out_p), jnp.float32).at[:D_hid, :D_out].set(w2)
    b2_p = jnp.zeros((1, D_out_p), jnp.float32).at[:, :D_out].set(b2)

    # bf16 operands for the MXU; accumulation stays f32 inside the kernel.
    x_p = x_p.astype(jnp.bfloat16)
    w1_p = w1_p.astype(jnp.bfloat16)
    w2_p = w2_p.astype(jnp.bfloat16)

    # Rough VMEM budget (double-buffered activation tiles + resident weights),
    # capped at 64 MiB so it is legal on v7x as well as v5e/v6e.
    vmem_bytes = (2 * TB * D_in_p * 2            # x tiles (bf16, 2 buffers)
                  + 2 * TB * D_out_p * 4         # out tiles (f32, 2 buffers)
                  + 2 * (D_in_p * D_hid_p + D_hid_p * D_out_p) * 2  # weights
                  + 2 * (D_hid_p + D_out_p) * 4  # biases
                  + TB * D_hid_p * 4)            # intermediate h
    vmem_limit = min(max(2 * vmem_bytes, 32 * 1024 * 1024), 64 * 1024 * 1024)

    out_p = pl.pallas_call(
        cascade_kernel,
        out_shape=jax.ShapeDtypeStruct((B_p, D_out_p), jnp.float32),
        grid=(B_p // TB,),
        in_specs=[
            pl.BlockSpec((TB, D_in_p), lambda i: (i, 0)),        # x tile
            pl.BlockSpec((D_in_p, D_hid_p), lambda i: (0, 0)),   # w1 (resident)
            pl.BlockSpec((1, D_hid_p), lambda i: (0, 0)),        # b1 (resident)
            pl.BlockSpec((D_hid_p, D_out_p), lambda i: (0, 0)),  # w2 (resident)
            pl.BlockSpec((1, D_out_p), lambda i: (0, 0)),        # b2 (resident)
        ],
        out_specs=pl.BlockSpec((TB, D_out_p), lambda i: (i, 0)),
        compiler_params=pltpu.CompilerParams(
            dimension_semantics=("parallel",),
            vmem_limit_bytes=int(vmem_limit)),
    )(x_p, w1_p, b1_p, w2_p, b2_p)

    return out_p[:B, :D_out]


if __name__ == "__main__":
    key = jax.random.PRNGKey(0)
    B, D_in, D_hid, D_out = 8, 32, 64, 32
    gain = 2.0
    cascade_type = 'ila'

    k_x, k_w1, k_b1, k_w2, k_b2 = jax.random.split(key, 5)
    x = jax.random.normal(k_x, (B, D_in), dtype=jnp.float32)
    # Deterministic synthetic parameters (stand-in for the wrapped sub-models).
    w1 = jax.random.normal(k_w1, (D_in, D_hid), dtype=jnp.float32) * 0.1
    b1 = jax.random.normal(k_b1, (1, D_hid), dtype=jnp.float32) * 0.1
    w2 = jax.random.normal(k_w2, (D_hid, D_out), dtype=jnp.float32) * 0.1
    b2 = jax.random.normal(k_b2, (1, D_out), dtype=jnp.float32) * 0.1

    out = cascade_forward(x, w1, b1, w2, b2, gain=gain,
                          cascade_type=cascade_type)
    out = jax.block_until_ready(out)
    assert out.shape == (B, D_out)

    # Pure-JAX f32 reference of the CascadeModel semantics.
    ref = jnp.maximum(x @ w1 + b1, 0.0)
    if cascade_type == 'ila' and gain:
        ref = ref / gain
    ref = ref @ w2 + b2
    # bf16 MXU operands (f32 accumulation) => loosened tolerance vs. pure f32.
    assert jnp.allclose(out, ref, atol=3e-2, rtol=3e-2), \
        float(jnp.max(jnp.abs(out - ref)))

    print("KERNEL_OK")
</pallas_src>

<mosaic_0001>
module attributes {stable_mosaic.version = 11 : i64} {
  func.func @cascade_kernel(%arg0: i32, %arg1: memref<8x128xbf16, #tpu.memory_space<vmem>>, %arg2: memref<128x128xbf16, #tpu.memory_space<vmem>>, %arg3: memref<1x128xf32, #tpu.memory_space<vmem>>, %arg4: memref<128x128xbf16, #tpu.memory_space<vmem>>, %arg5: memref<1x128xf32, #tpu.memory_space<vmem>>, %arg6: memref<8x128xf32, #tpu.memory_space<vmem>>) attributes {dimension_semantics = [#tpu.dimension_semantics<parallel>], iteration_bounds = array<i64: 1>, scalar_prefetch = 0 : i64, scratch_operands = 0 : i64, tpu.core_type = #tpu.core_type<tc>, window_params = [{transform_indices = @transform_0, window_bounds = array<i64: 8, 128>}, {pipeline_mode = #tpu.pipeline_mode<synchronous>, transform_indices = @transform_1, window_bounds = array<i64: 128, 128>}, {pipeline_mode = #tpu.pipeline_mode<synchronous>, transform_indices = @transform_2, window_bounds = array<i64: 1, 128>}, {pipeline_mode = #tpu.pipeline_mode<synchronous>, transform_indices = @transform_3, window_bounds = array<i64: 128, 128>}, {pipeline_mode = #tpu.pipeline_mode<synchronous>, transform_indices = @transform_4, window_bounds = array<i64: 1, 128>}, {transform_indices = @transform_5, window_bounds = array<i64: 8, 128>}]} {
    %c0 = arith.constant 0 : index
    %c0_0 = arith.constant 0 : index
    %0 = vector.load %arg1[%c0, %c0_0] : memref<8x128xbf16, #tpu.memory_space<vmem>>, vector<8x128xbf16>
    %c0_1 = arith.constant 0 : index
    %c0_2 = arith.constant 0 : index
    %1 = vector.load %arg2[%c0_1, %c0_2] : memref<128x128xbf16, #tpu.memory_space<vmem>>, vector<128x128xbf16>
    %cst = arith.constant dense<0.000000e+00> : vector<8x128xf32>
    %2 = tpu.matmul %0, %1, %cst {dimension_numbers = #tpu.dot_dimension_numbers<[1], [0], [0], [1], [0, 0, 1, 1], [], []>} : vector<8x128xbf16>, vector<128x128xbf16>, vector<8x128xf32> -> vector<8x128xf32>
    %c0_3 = arith.constant 0 : index
    %c0_4 = arith.constant 0 : index
    %3 = vector.load %arg3[%c0_3, %c0_4] : memref<1x128xf32, #tpu.memory_space<vmem>>, vector<1x128xf32>
    %4 = vector.broadcast %3 : vector<1x128xf32> to vector<8x128xf32>
    %5 = arith.addf %2, %4 : vector<8x128xf32>
    %cst_5 = arith.constant 0.000000e+00 : f32
    %6 = vector.broadcast %cst_5 : f32 to vector<8x128xf32>
    %7 = arith.maximumf %5, %6 : vector<8x128xf32>
    %8 = arith.truncf %7 : vector<8x128xf32> to vector<8x128xbf16>
    %c0_6 = arith.constant 0 : index
    %c0_7 = arith.constant 0 : index
    %9 = vector.load %arg4[%c0_6, %c0_7] : memref<128x128xbf16, #tpu.memory_space<vmem>>, vector<128x128xbf16>
    %cst_8 = arith.constant dense<0.000000e+00> : vector<8x128xf32>
    %10 = tpu.matmul %8, %9, %cst_8 {dimension_numbers = #tpu.dot_dimension_numbers<[1], [0], [0], [1], [0, 0, 1, 1], [], []>} : vector<8x128xbf16>, vector<128x128xbf16>, vector<8x128xf32> -> vector<8x128xf32>
    %c0_9 = arith.constant 0 : index
    %c0_10 = arith.constant 0 : index
    %11 = vector.load %arg5[%c0_9, %c0_10] : memref<1x128xf32, #tpu.memory_space<vmem>>, vector<1x128xf32>
    %12 = vector.broadcast %11 : vector<1x128xf32> to vector<8x128xf32>
    %13 = arith.addf %10, %12 : vector<8x128xf32>
    %c0_11 = arith.constant 0 : index
    %c0_12 = arith.constant 0 : index
    %14 = vector.load %arg6[%c0_11, %c0_12] : memref<8x128xf32, #tpu.memory_space<vmem>>, vector<8x128xf32>
    tpu.vector_store %arg6[%c0_11, %c0_12], %13 {strides = array<i32>} : memref<8x128xf32, #tpu.memory_space<vmem>>, vector<8x128xf32>,
    return
  }
  func.func @transform_0(%arg0: i32) -> (i32, i32) {
    %c0_i32 = arith.constant 0 : i32
    %c0_i32_0 = arith.constant 0 : i32
    return %arg0, %c0_i32 : i32, i32
  }
  func.func @transform_1(%arg0: i32) -> (i32, i32) {
    %c0_i32 = arith.constant 0 : i32
    %c0_i32_0 = arith.constant 0 : i32
    %c0_i32_1 = arith.constant 0 : i32
    return %c0_i32, %c0_i32_0 : i32, i32
  }
  func.func @transform_2(%arg0: i32) -> (i32, i32) {
    %c0_i32 = arith.constant 0 : i32
    %c0_i32_0 = arith.constant 0 : i32
    %c0_i32_1 = arith.constant 0 : i32
    return %c0_i32, %c0_i32_0 : i32, i32
  }
  func.func @transform_3(%arg0: i32) -> (i32, i32) {
    %c0_i32 = arith.constant 0 : i32
    %c0_i32_0 = arith.constant 0 : i32
    %c0_i32_1 = arith.constant 0 : i32
    return %c0_i32, %c0_i32_0 : i32, i32
  }
  func.func @transform_4(%arg0: i32) -> (i32, i32) {
    %c0_i32 = arith.constant 0 : i32
    %c0_i32_0 = arith.constant 0 : i32
    %c0_i32_1 = arith.constant 0 : i32
    return %c0_i32, %c0_i32_0 : i32, i32
  }
  func.func @transform_5(%arg0: i32) -> (i32, i32) {
    %c0_i32 = arith.constant 0 : i32
    %c0_i32_0 = arith.constant 0 : i32
    return %arg0, %c0_i32 : i32, i32
  }
}

</mosaic_0001>

<bundles_post_ra>
// kernel: tpu_custom_call.1
= control target key start
LH: loop header
LB: loop body
LE: loop exit
PB: predicated region body
PF: predicated region fallthrough
CT: control target
= control target key end

     0   :  { %10 = vsyncpa [#allocation3], 0  ;;  %s494_s0 = inlined_call_operand.hbm [shape: bf16[8,128], index: 0, kind: input, shape index: {}]   ;;  %s495_s1 = inlined_call_operand.hbm [shape: bf16[128,128], index: 1, kind: input, shape index: {}]   ;;  %s496_s2 = inlined_call_operand.vmem [shape: f32[1,128], index: 2, kind: input, shape index: {}]   ;;  %s497_s3 = inlined_call_operand.hbm [shape: bf16[128,128], index: 3, kind: input, shape index: {}]   ;;  %s498_s4 = inlined_call_operand.vmem [shape: f32[1,128], index: 4, kind: input, shape index: {}]   ;;  %s499_s5 = inlined_call_operand.hbm [shape: f32[8,128], index: 5, kind: output, shape index: {}]  }
   0x1   :  { %11 = vsyncpa [#allocation6], 0  ;;  %s28_s20 = sshll.u32 %s495_s1, 4  ;;  %s29_s20 = int_to_ptr.hbm [resolvable:$true] %s28_s20 }
   0x2   :  { %12 = vsyncpa [#allocation4], 0  ;;  %s440_s21 = smov [#allocation5]   ;;  %s18_s25 = sshll.u32 %s494_s0, 4  ;;  %s19_s25 = int_to_ptr.hbm [resolvable:$true] %s18_s25 }
   0x3   :  { %s30_s22 = sshll.u32 %s440_s21, 4  ;;  %s441_s26 = smov 64   ;;  %s31_s22 = int_to_ptr.vmem [resolvable:$true] %s30_s22 }
   0x4   :  { %s442_s27 = smov 4   ;;  %s443_s28 = smov [#allocation2]  }
   0x5   :  { %36 = dma.hbm_to_vmem [thread:$0]  %s29_s20, 1024, %s31_s22, [#allocation6], %s441_s26, %s441_s26, %s442_s27  }
   0x6   :  { %s20_s29 = sshll.u32 %s443_s28, 4  ;;  %s43_s7 = sshll.u32 %s497_s3, 4  ;;  %s21_s29 = int_to_ptr.vmem [resolvable:$true] %s20_s29  ;;  %s44_s7 = int_to_ptr.hbm [resolvable:$true] %s43_s7 }
   0x7   :  { %23 = dma.hbm_to_vmem [thread:$0]  %s19_s25, 64, %s21_s29, [#allocation3]  }
   0x8   :  { %s444_s1 = smov [#allocation7]  }
   0x9   :  { %s45_s8 = sshll.u32 %s444_s1, 4  ;;  %s46_s8 = int_to_ptr.vmem [resolvable:$true] %s45_s8 }
   0xa   :  { %51 = dma.hbm_to_vmem [thread:$0]  %s44_s7, 1024, %s46_s8, [#allocation6], %s441_s26, %s441_s26, %s442_s27  }
   0xb   :  { %434 = dma.done.wait [#allocation3], 64  }
   0xc   :  { %435 = vsyncadd [#allocation3], 4294967232 }
   0xd   :  { %436 = dma.done.wait [#allocation6], 2048  }
   0xe   :  { %437 = vsyncadd [#allocation6], 4294965248  ;;  %v321_v0 = vld [vmem:[#allocation5 + $0x38] sm:$0xff]  ;;  %v320_v1 = vld [vmem:[#allocation5 + $0x30] sm:$0xff]  ;;  %s445_s11 = smov [#allocation8]   ;;  %s239_s15 = sshll.u32 %s499_s5, 4  ;;  %s240_s15 = int_to_ptr.hbm [resolvable:$true] %s239_s15 }
   0xf   :  { %135 = vmatpush.bf16.msra.mxu0 %v321_v0  ;;  %v329_v2 = vld [vmem:[#allocation7 + $0x38] sm:$0xff]  ;;  %v328_v3 = vld [vmem:[#allocation7 + $0x30] sm:$0xff]  ;;  %v319_v4 = vld [vmem:[#allocation5 + $0x28] sm:$0xff]  ;;  %s237_s12 = sshll.u32 %s445_s11, 4  ;;  %s238_s12 = int_to_ptr.vmem [resolvable:$true] %s237_s12 }
  0x10   :  { %218 = vmatpush.bf16.msra.mxu1 %v329_v2  ;;  %v327_v5 = vld [vmem:[#allocation7 + $0x28] sm:$0xff]  ;;  %v318_v6 = vld [vmem:[#allocation5 + $0x20] sm:$0xff]  ;;  %v317_v8 = vld [vmem:[#allocation5 + $0x18] sm:$0xff] }
  0x11   :  { %v326_v7 = vld [vmem:[#allocation7 + $0x20] sm:$0xff]  ;;  %v325_v9 = vld [vmem:[#allocation7 + $0x18] sm:$0xff]  ;;  %v316_v10 = vld [vmem:[#allocation5 + $0x10] sm:$0xff] }
  0x12   :  { %v324_v11 = vld [vmem:[#allocation7 + $0x10] sm:$0xff]  ;;  %v315_v12 = vld [vmem:[#allocation5 + $0x8] sm:$0xff]  ;;  %v314_v13 = vld [vmem:[#allocation5] sm:$0xff] }
  0x13   :  { %136 = vmatpush.bf16.msra.mxu0 %v320_v1  ;;  %v66_v14 = vld [vmem:[#allocation2] sm:$0xf]  ;;  %v323_v15 = vld [vmem:[#allocation7 + $0x8] sm:$0xff]  ;;  %v322_v16 = vld [vmem:[#allocation7] sm:$0xff] }
  0x14   :  { %219 = vmatpush.bf16.msra.mxu1 %v328_v3  ;;  %v336_v17 = vld [vmem:[%s496_s2] ss:$0 sm:$0xff] }
  0x15   :  { %v337_v23 = vld [vmem:[%s498_s4] ss:$0 sm:$0xff] }
  0x17   :  { %137 = vmatpush.bf16.msra.mxu0 %v319_v4 }
  0x18   :  { %220 = vmatpush.bf16.msra.mxu1 %v327_v5 }
  0x1b   :  { %138 = vmatpush.bf16.msra.mxu0 %v318_v6 }
  0x1c   :  { %221 = vmatpush.bf16.msra.mxu1 %v326_v7 }
  0x1f   :  { %139 = vmatpush.bf16.msra.mxu0 %v317_v8 }
  0x20   :  { %222 = vmatpush.bf16.msra.mxu1 %v325_v9 }
  0x23   :  { %140 = vmatpush.bf16.msra.mxu0 %v316_v10 }
  0x24   :  { %223 = vmatpush.bf16.msra.mxu1 %v324_v11 }
  0x27   :  { %141 = vmatpush.bf16.msra.mxu0 %v315_v12 }
  0x28   :  { %224 = vmatpush.bf16.msra.mxu1 %v323_v15 }
  0x2b   :  { %142 = vmatpush.bf16.msra.mxu0 %v314_v13 }
  0x2c   :  { %225 = vmatpush.bf16.msra.mxu1 %v322_v16 }
  0x2e   :  { %143 = vmatmul.bf16.vlgmr.msra.gmra.mxu0 %v66_v14 }
  0xab   :  { %v144_v18 = vpop.f32.mrf.mxu0 }
  0xac   :  { %v145_v19 = vadd.f32 %v336_v17, %v144_v18 }
  0xae   :  { %v148_v20 = vmax.f32 %v145_v19, 0.0 }
  0xb0   :  { %v149_v21 = vpack.c.bf16 %v148_v20, %v148_v20 }
  0xb2   :  { %226 = vmatmul.bf16.vlgmr.msra.gmra.mxu1 %v149_v21 }
  0xb3   :  { %v146_v22 = vpop.f32.mrf.mxu0 }
 0x12f   :  { %v227_v24 = vpop.f32.mrf.mxu1 }
 0x130   :  { %v228_v25 = vadd.f32 %v337_v23, %v227_v24 }
 0x132   :  { %231 = vst [vmem:[#allocation8] sm:$0xff] %v228_v25 }
 0x133   :  { %242 = dma.vmem_to_hbm [thread:$0]  %s238_s12, 128, %s240_s15, [#allocation4]  }
 0x137   :  { %v229_v26 = vpop.f32.mrf.mxu1 }
 0x138   :  { %438 = dma.done.wait [#allocation4], 128  }
 0x139   :  { %439 = vsyncadd [#allocation4], 4294967168 }
 0x13a   :  { %247 = vsyncpa [#allocation3], 1 }
 0x13b   :  { %248 = vsyncpa [#allocation6], 1 }
 0x13c   :  { %249 = vsyncpa [#allocation4], 1 }

</bundles_post_ra>
